<compile_context>
chip_gen: v7x
topology: tpu7x:2x2x1
jax: 0.10.0
libtpu: 0.0.40
codegen_flags: <defaults>
</compile_context>

<pallas_src>
import jax
import jax.numpy as jnp
from jax.experimental import pallas as pl
from jax.experimental.pallas import tpu as pltpu

HPAD = 8  # padded feature width for all hidden/output dims (f32 sublane width)


def mlp_kernel(x_ref, w1_ref, b1_ref, w2_ref, b2_ref, w3_ref, b3_ref, o_ref):
    # fc1 -> relu  (dropout1 is identity in eval mode)
    h1 = jnp.dot(x_ref[...], w1_ref[...], preferred_element_type=jnp.float32)
    h1 = jnp.maximum(h1 + b1_ref[...], 0.0)
    # fc2 -> relu  (dropout2 is identity in eval mode)
    h2 = jnp.dot(h1, w2_ref[...], preferred_element_type=jnp.float32)
    h2 = jnp.maximum(h2 + b2_ref[...], 0.0)
    # fc3
    out = jnp.dot(h2, w3_ref[...], preferred_element_type=jnp.float32)
    o_ref[...] = out + b3_ref[...]


def prepare_params(params):
    """One-time (hoisted) conversion of PyTorch-shaped params -> padded kernel params.

    PyTorch Linear weight is (out, in); we transpose to (in, out) and zero-pad
    both the input-feature dim (for fc2/fc3) and the output-feature dim to HPAD.
    Biases are zero-padded — this MUST stay zero (see header comment).
    """
    def pad_w(w, in_pad, out_pad):
        wt = w.T.astype(jnp.float32)  # (in, out)
        return jnp.pad(wt, ((0, in_pad - wt.shape[0]), (0, out_pad - wt.shape[1])))

    def pad_b(b, out_pad):
        b = b.astype(jnp.float32)
        return jnp.pad(b, (0, out_pad - b.shape[0])).reshape(1, out_pad)

    dim = params["w1"].shape[1]
    return {
        "w1": pad_w(params["w1"], dim, HPAD),    # (dim, 8), real cols: 2
        "b1": pad_b(params["b1"], HPAD),         # (1, 8)
        "w2": pad_w(params["w2"], HPAD, HPAD),   # (8, 8),   real block: (2, 2)
        "b2": pad_b(params["b2"], HPAD),         # (1, 8)
        "w3": pad_w(params["w3"], HPAD, HPAD),   # (8, 8),   real block: (2, 1)
        "b3": pad_b(params["b3"], HPAD),         # (1, 8)
    }


def net_forward(x, padded_params, *, tb=None):
    """x: (B, dim) float32. padded_params: output of prepare_params()."""
    B, dim = x.shape
    if tb is None:
        # Sweepable; 512-2048 rows hits ~85% of HBM roofline on large batches.
        # Tiny VMEM footprint (~2*tb*(dim+8)*4 B double-buffered) fits every
        # generation's scoped VMEM (v5e 16 MiB default, v7x 64 MiB total).
        tb = max(8, min(1024, ((B + 7) // 8) * 8))
    assert tb % 8 == 0 or tb == B, "tb must be a multiple of 8 (f32 sublane) or exactly B"

    grid = (pl.cdiv(B, tb),)
    out_padded = pl.pallas_call(
        mlp_kernel,
        out_shape=jax.ShapeDtypeStruct((B, HPAD), jnp.float32),
        grid_spec=pltpu.PrefetchScalarGridSpec(
            num_scalar_prefetch=0,
            grid=grid,
            in_specs=[
                pl.BlockSpec((tb, dim), lambda i: (i, 0)),       # x tile
                pl.BlockSpec((dim, HPAD), lambda i: (0, 0)),     # w1
                pl.BlockSpec((1, HPAD), lambda i: (0, 0)),       # b1
                pl.BlockSpec((HPAD, HPAD), lambda i: (0, 0)),    # w2
                pl.BlockSpec((1, HPAD), lambda i: (0, 0)),       # b2
                pl.BlockSpec((HPAD, HPAD), lambda i: (0, 0)),    # w3
                pl.BlockSpec((1, HPAD), lambda i: (0, 0)),       # b3
            ],
            out_specs=pl.BlockSpec((tb, HPAD), lambda i: (i, 0)),
        ),
        compiler_params=pltpu.CompilerParams(
            dimension_semantics=("parallel",)),  # batch axis shards across TCs (v7x)
    )(x.astype(jnp.float32), padded_params["w1"], padded_params["b1"],
      padded_params["w2"], padded_params["b2"],
      padded_params["w3"], padded_params["b3"])

    return out_padded[:, :1]  # (B, 1), matches nn.Linear(2, 1) output


def init_params(key, dim):
    """Deterministic parameter init mimicking nn.Linear shapes (out, in)."""
    ks = jax.random.split(key, 6)

    def lin(kw, kb, fan_in, fan_out):
        bound = 1.0 / jnp.sqrt(fan_in)
        w = jax.random.uniform(kw, (fan_out, fan_in), jnp.float32, -bound, bound)
        b = jax.random.uniform(kb, (fan_out,), jnp.float32, -bound, bound)
        return w, b

    w1, b1 = lin(ks[0], ks[1], dim, 2)
    w2, b2 = lin(ks[2], ks[3], 2, 2)
    w3, b3 = lin(ks[4], ks[5], 2, 1)
    return {"w1": w1, "b1": b1, "w2": w2, "b2": b2, "w3": w3, "b3": b3}


def net_forward_ref(x, p):
    h = jnp.maximum(x @ p["w1"].T + p["b1"], 0.0)
    h = jnp.maximum(h @ p["w2"].T + p["b2"], 0.0)
    return h @ p["w3"].T + p["b3"]


if __name__ == "__main__":
    # TODO(synk): dropout1/dropout2 are identity here (eval-mode semantics);
    # training-mode stochastic dropout is not implemented.
    key = jax.random.PRNGKey(0)
    kx, kp = jax.random.split(key)
    B, dim = 64, 32
    x = jax.random.normal(kx, (B, dim), jnp.float32)
    params = init_params(kp, dim)
    padded_params = prepare_params(params)  # hoisted: done once, not per call

    out = net_forward(x, padded_params, tb=16)  # grid of 4 steps exercises pipelining
    out = jax.block_until_ready(out)

    ref = net_forward_ref(x, params)
    assert out.shape == (B, 1)
    assert jnp.allclose(out, ref, atol=1e-5, rtol=1e-5)
    print("KERNEL_OK")
</pallas_src>

<mosaic_0001>
module attributes {stable_mosaic.version = 11 : i64} {
  func.func @mlp_kernel(%arg0: i32, %arg1: memref<16x32xf32, #tpu.memory_space<vmem>>, %arg2: memref<32x8xf32, #tpu.memory_space<vmem>>, %arg3: memref<1x8xf32, #tpu.memory_space<vmem>>, %arg4: memref<8x8xf32, #tpu.memory_space<vmem>>, %arg5: memref<1x8xf32, #tpu.memory_space<vmem>>, %arg6: memref<8x8xf32, #tpu.memory_space<vmem>>, %arg7: memref<1x8xf32, #tpu.memory_space<vmem>>, %arg8: memref<16x8xf32, #tpu.memory_space<vmem>>) attributes {dimension_semantics = [#tpu.dimension_semantics<parallel>], iteration_bounds = array<i64: 4>, scalar_prefetch = 0 : i64, scratch_operands = 0 : i64, tpu.core_type = #tpu.core_type<tc>, window_params = [{transform_indices = @transform_0, window_bounds = array<i64: 16, 32>}, {pipeline_mode = #tpu.pipeline_mode<synchronous>, transform_indices = @transform_1, window_bounds = array<i64: 32, 8>}, {pipeline_mode = #tpu.pipeline_mode<synchronous>, transform_indices = @transform_2, window_bounds = array<i64: 1, 8>}, {pipeline_mode = #tpu.pipeline_mode<synchronous>, transform_indices = @transform_3, window_bounds = array<i64: 8, 8>}, {pipeline_mode = #tpu.pipeline_mode<synchronous>, transform_indices = @transform_4, window_bounds = array<i64: 1, 8>}, {pipeline_mode = #tpu.pipeline_mode<synchronous>, transform_indices = @transform_5, window_bounds = array<i64: 8, 8>}, {pipeline_mode = #tpu.pipeline_mode<synchronous>, transform_indices = @transform_6, window_bounds = array<i64: 1, 8>}, {transform_indices = @transform_7, window_bounds = array<i64: 16, 8>}]} {
    %c0 = arith.constant 0 : index
    %c0_0 = arith.constant 0 : index
    %0 = vector.load %arg1[%c0, %c0_0] : memref<16x32xf32, #tpu.memory_space<vmem>>, vector<16x32xf32>
    %c0_1 = arith.constant 0 : index
    %c0_2 = arith.constant 0 : index
    %1 = vector.load %arg2[%c0_1, %c0_2] : memref<32x8xf32, #tpu.memory_space<vmem>>, vector<32x8xf32>
    %cst = arith.constant dense<0.000000e+00> : vector<16x8xf32>
    %2 = tpu.matmul %0, %1, %cst {dimension_numbers = #tpu.dot_dimension_numbers<[1], [0], [0], [1], [0, 0, 1, 1], [], []>} : vector<16x32xf32>, vector<32x8xf32>, vector<16x8xf32> -> vector<16x8xf32>
    %c0_3 = arith.constant 0 : index
    %c0_4 = arith.constant 0 : index
    %3 = vector.load %arg3[%c0_3, %c0_4] : memref<1x8xf32, #tpu.memory_space<vmem>>, vector<1x8xf32>
    %4 = vector.broadcast %3 : vector<1x8xf32> to vector<16x8xf32>
    %5 = arith.addf %2, %4 : vector<16x8xf32>
    %cst_5 = arith.constant 0.000000e+00 : f32
    %6 = vector.broadcast %cst_5 : f32 to vector<16x8xf32>
    %7 = arith.maximumf %5, %6 : vector<16x8xf32>
    %c0_6 = arith.constant 0 : index
    %c0_7 = arith.constant 0 : index
    %8 = vector.load %arg4[%c0_6, %c0_7] : memref<8x8xf32, #tpu.memory_space<vmem>>, vector<8x8xf32>
    %cst_8 = arith.constant dense<0.000000e+00> : vector<16x8xf32>
    %9 = tpu.matmul %7, %8, %cst_8 {dimension_numbers = #tpu.dot_dimension_numbers<[1], [0], [0], [1], [0, 0, 1, 1], [], []>} : vector<16x8xf32>, vector<8x8xf32>, vector<16x8xf32> -> vector<16x8xf32>
    %c0_9 = arith.constant 0 : index
    %c0_10 = arith.constant 0 : index
    %10 = vector.load %arg5[%c0_9, %c0_10] : memref<1x8xf32, #tpu.memory_space<vmem>>, vector<1x8xf32>
    %11 = vector.broadcast %10 : vector<1x8xf32> to vector<16x8xf32>
    %12 = arith.addf %9, %11 : vector<16x8xf32>
    %cst_11 = arith.constant 0.000000e+00 : f32
    %13 = vector.broadcast %cst_11 : f32 to vector<16x8xf32>
    %14 = arith.maximumf %12, %13 : vector<16x8xf32>
    %c0_12 = arith.constant 0 : index
    %c0_13 = arith.constant 0 : index
    %15 = vector.load %arg6[%c0_12, %c0_13] : memref<8x8xf32, #tpu.memory_space<vmem>>, vector<8x8xf32>
    %cst_14 = arith.constant dense<0.000000e+00> : vector<16x8xf32>
    %16 = tpu.matmul %14, %15, %cst_14 {dimension_numbers = #tpu.dot_dimension_numbers<[1], [0], [0], [1], [0, 0, 1, 1], [], []>} : vector<16x8xf32>, vector<8x8xf32>, vector<16x8xf32> -> vector<16x8xf32>
    %c0_15 = arith.constant 0 : index
    %c0_16 = arith.constant 0 : index
    %17 = vector.load %arg7[%c0_15, %c0_16] : memref<1x8xf32, #tpu.memory_space<vmem>>, vector<1x8xf32>
    %18 = vector.broadcast %17 : vector<1x8xf32> to vector<16x8xf32>
    %19 = arith.addf %16, %18 : vector<16x8xf32>
    %c0_17 = arith.constant 0 : index
    %c0_18 = arith.constant 0 : index
    %20 = vector.load %arg8[%c0_17, %c0_18] : memref<16x8xf32, #tpu.memory_space<vmem>>, vector<16x8xf32>
    tpu.vector_store %arg8[%c0_17, %c0_18], %19 {strides = array<i32>} : memref<16x8xf32, #tpu.memory_space<vmem>>, vector<16x8xf32>,
    return
  }
  func.func @transform_0(%arg0: i32) -> (i32, i32) {
    %c0_i32 = arith.constant 0 : i32
    %c0_i32_0 = arith.constant 0 : i32
    return %arg0, %c0_i32 : i32, i32
  }
  func.func @transform_1(%arg0: i32) -> (i32, i32) {
    %c0_i32 = arith.constant 0 : i32
    %c0_i32_0 = arith.constant 0 : i32
    %c0_i32_1 = arith.constant 0 : i32
    return %c0_i32, %c0_i32_0 : i32, i32
  }
  func.func @transform_2(%arg0: i32) -> (i32, i32) {
    %c0_i32 = arith.constant 0 : i32
    %c0_i32_0 = arith.constant 0 : i32
    %c0_i32_1 = arith.constant 0 : i32
    return %c0_i32, %c0_i32_0 : i32, i32
  }
  func.func @transform_3(%arg0: i32) -> (i32, i32) {
    %c0_i32 = arith.constant 0 : i32
    %c0_i32_0 = arith.constant 0 : i32
    %c0_i32_1 = arith.constant 0 : i32
    return %c0_i32, %c0_i32_0 : i32, i32
  }
  func.func @transform_4(%arg0: i32) -> (i32, i32) {
    %c0_i32 = arith.constant 0 : i32
    %c0_i32_0 = arith.constant 0 : i32
    %c0_i32_1 = arith.constant 0 : i32
    return %c0_i32, %c0_i32_0 : i32, i32
  }
  func.func @transform_5(%arg0: i32) -> (i32, i32) {
    %c0_i32 = arith.constant 0 : i32
    %c0_i32_0 = arith.constant 0 : i32
    %c0_i32_1 = arith.constant 0 : i32
    return %c0_i32, %c0_i32_0 : i32, i32
  }
  func.func @transform_6(%arg0: i32) -> (i32, i32) {
    %c0_i32 = arith.constant 0 : i32
    %c0_i32_0 = arith.constant 0 : i32
    %c0_i32_1 = arith.constant 0 : i32
    return %c0_i32, %c0_i32_0 : i32, i32
  }
  func.func @transform_7(%arg0: i32) -> (i32, i32) {
    %c0_i32 = arith.constant 0 : i32
    %c0_i32_0 = arith.constant 0 : i32
    return %arg0, %c0_i32 : i32, i32
  }
}

</mosaic_0001>

<bundles_post_ra>
// kernel: tpu_custom_call.1
= control target key start
LH: loop header
LB: loop body
LE: loop exit
PB: predicated region body
PF: predicated region fallthrough
CT: control target
= control target key end

     0   :  { %s735_s24 = smov 0   ;;  %s792_s0 = inlined_call_operand.vmem [shape: f32[64,32], index: 0, kind: input, shape index: {}]   ;;  %s793_s1 = inlined_call_operand.vmem [shape: f32[32,8], index: 1, kind: input, shape index: {}]   ;;  %s794_s2 = inlined_call_operand.vmem [shape: f32[1,8], index: 2, kind: input, shape index: {}]   ;;  %s795_s3 = inlined_call_operand.vmem [shape: f32[8,8], index: 3, kind: input, shape index: {}]   ;;  %s796_s4 = inlined_call_operand.vmem [shape: f32[1,8], index: 4, kind: input, shape index: {}]   ;;  %s797_s5 = inlined_call_operand.vmem [shape: f32[8,8], index: 5, kind: input, shape index: {}]   ;;  %s798_s6 = inlined_call_operand.vmem [shape: f32[1,8], index: 6, kind: input, shape index: {}]   ;;  %s799_s7 = inlined_call_operand.vmem [shape: f32[64,8], index: 7, kind: output, shape index: {}]  }
   0x1 LB: > { %s618_s25 = sadd.s32 4294967295, %s693_s24   ;;  %p622_p0 = scmp.ge.s32.totalorder %s693_s24, 1  ;;  %s693_s24 = sphi %s735_s24, %s17_s24  }
   0x2   : > { %p238_p1 = scmp.lt.s32.totalorder %s693_s24, 5 }
   0x4   : > { %p239_p2 = pnand %p622_p0, %p238_p1 }
   0x5   : > { %v284_v0 = vld [vmem:[%s793_s1] sm:$0xff] (!%p239_p2)  ;;  %v285_v1 = vld [vmem:[%s793_s1 + $0x8] sm:$0xff] (!%p239_p2)  ;;  %v286_v2 = vld [vmem:[%s793_s1 + $0x10] sm:$0xff] (!%p239_p2)  ;;  %s623_s9 = sshll.u32 (!%p239_p2), %s618_s25, 1  ;;  %vm295_vm0 = vcmask (!%p239_p2), 261120   ;;  %vm387_vm1 = vcmask (!%p239_p2), 64512  }
   0x6   : > { %242 = sbr.rel (%p239_p2) target bundleno = 670 (0x29e), region = 48  ;;  %v671_v3 = vpack.c.bf16 (!%p239_p2), %v285_v1, %v284_v0  ;;  %v287_v4 = vld [vmem:[%s793_s1 + $0x18] sm:$0xff] (!%p239_p2)  ;;  %p271_p3 = scmp.lt.s32.totalorder (!%p239_p2), %s623_s9, 7  ;;  %v379_v8 = vld [vmem:[%s795_s3] sm:$0xff] (!%p239_p2) }
   0x7   : > { %v675_v5 = vpack.c.bf16 (!%p239_p2), %v287_v4, %v286_v2  ;;  %661 = vmatprep.subr.mxu1 (!%p239_p2), %v379_v8  ;;  %v627_v9 = vld [vmem:[%s794_s2] ss:$0 sm:$0xff] (!%p239_p2) }
   0x8   : > { %672 = vmatprep.subr.bf16.mxu0 (!%p239_p2), %v671_v3  ;;  %662 = vmatpush3.msra.mxu1 (!%p239_p2), %v379_v8  ;;  %v471_v16 = vld [vmem:[%s797_s5] sm:$0xff] (!%p239_p2) }
   0x9   : > { %674 = vmatpush3.bf16.msra.mxu0 (!%p239_p2), %v671_v3  ;;  %666 = vmatprep.subr.mxu1 (!%p239_p2), %v471_v16  ;;  %v630_v17 = vld [vmem:[%s796_s4] ss:$0 sm:$0xff] (!%p239_p2) }
   0xa   : > { %676 = vmatprep.subr.bf16.mxu0 (!%p239_p2), %v675_v5  ;;  %v633_v24 = vld [vmem:[%s798_s6] ss:$0 sm:$0xff] (!%p239_p2) }
   0xd   : > { %s801_s9 = smov (!%p271_p3, %s623_s9), 7  ;;  %678 = vmatpush3.bf16.msra.mxu0 %v675_v5 }
   0xe   : > { %s624_s12 = sshll.u32 %s801_s9, 3 }
   0xf   : > { %s274_s15 = scalar_lea.vmem %s792_s0, %s624_s12  ;;  %s280_s29 = scalar_lea.vmem %s799_s7, %s624_s12 }
  0x10   : > { %v282_v6 = vld [vmem:[%s274_s15] sm:$0xff]  ;;  %v283_v7 = vld [vmem:[%s274_s15 + $0x8] sm:$0xff] }
  0x11   : > { %658 = vmatprep.mubr.msk.f32.mxu0 %vm295_vm0, %v282_v6 }
  0x12   : > { %659 = vmatmul.mubr.msk.f32.vlgmr.msra.gmra.mrb[0].mxu0 %vm295_vm0, %v283_v7 }
  0xe5   : > { %v660_v10 = vpop.f32.mrb[0].mxu0 }
  0xe6   : > { %v374_v11 = vadd.f32 %v660_v10, %v627_v9  ;;  %v368_v12 = vpop.f32.mrb[1].mxu0 }
  0xe7   : > { %v369_v13 = vadd.f32 %v627_v9, %v368_v12 }
  0xe8   : > { %v378_v15 = vmax.f32 %v374_v11, 0.0 }
  0xe9   : > { %v377_v14 = vmax.f32 %v369_v13, 0.0 }
  0xeb   : > { %663 = vmatprep.mubr.msk.f32.mxu1 %vm387_vm1, %v377_v14 }
  0xec   : > { %664 = vmatmul.mubr.msk.f32.vlgmr.msra.gmra.mrb[0].mxu1 %vm387_vm1, %v378_v15 }
  0xed   : > { %667 = vmatpush3.msra.mxu1 %v471_v16 }
 0x1bf   : > { %v665_v18 = vpop.f32.mrb[0].mxu1 }
 0x1c0   : > { %v466_v19 = vadd.f32 %v665_v18, %v630_v17  ;;  %v460_v20 = vpop.f32.mrb[1].mxu1 }
 0x1c1   : > { %v461_v21 = vadd.f32 %v630_v17, %v460_v20 }
 0x1c2   : > { %v470_v23 = vmax.f32 %v466_v19, 0.0 }
 0x1c3   : > { %v469_v22 = vmax.f32 %v461_v21, 0.0 }
 0x1c5   : > { %668 = vmatprep.mubr.msk.f32.mxu1 %vm387_vm1, %v469_v22 }
 0x1c6   : > { %669 = vmatmul.mubr.msk.f32.vlgmr.msra.gmra.mrb[2].mxu1 %vm387_vm1, %v470_v23 }
 0x299   : > { %v670_v25 = vpop.f32.mrb[2].mxu1 }
 0x29a   : > { %v551_v26 = vpop.f32.mrb[3].mxu1  ;;  %v557_v28 = vadd.f32 %v670_v25, %v633_v24 }
 0x29b   : > { %v552_v27 = vadd.f32 %v633_v24, %v551_v26 }
 0x29c   : > { %561 = vst.msk [vmem:[%s280_s29 + $0x8] sm:$0xff] %vm387_vm1, %v557_v28 }
 0x29d   : > { %560 = vst.msk [vmem:[%s280_s29] sm:$0xff] %vm387_vm1, %v552_v27 }
 0x29e PF: > { %s17_s24 = sadd.s32 1, %s693_s24  }
 0x29f   : > { %p14_p4 = scmp.ge.s32.totalorder %s17_s24, 6  }
 0x2a1   :  { %16 = sbr.rel (!%p14_p4) target bundleno = 1 (0x1), region = 78 }

</bundles_post_ra>
